<compile_context>
chip_gen: v5e
topology: v5e:2x2
jax: 0.10.0
libtpu: 0.0.40
codegen_flags: <defaults>
</compile_context>

<pallas_src>
import math

import jax
import jax.numpy as jnp
from jax.experimental import pallas as pl
from jax.experimental.pallas import tpu as pltpu

NUM_GAMMAS = 25
HIDDEN = 512
OUT_PAD = 128  # NUM_GAMMAS * action_dim = 100, padded up to a full lane width.


def _round_up(n, m):
    return ((n + m - 1) // m) * m


def dqn_kernel(x_ref, w1_ref, b1_ref, w2_ref, b2_ref, w3_ref, b3_ref, out_ref):
    # Layer 1: Linear(state_dim -> 512). bf16 operands, f32 accumulation.
    h = jnp.dot(x_ref[...], w1_ref[...], preferred_element_type=jnp.float32)
    h = h + b1_ref[...]
    # ReLU -> bf16 so the materialized [TB, 512] inter-layer activation is
    # half-width if it round-trips through VMEM (TB >= 128 cannot stay in vregs).
    h = jnp.maximum(h, 0.0).astype(jnp.bfloat16)
    # Layer 2: Linear(512 -> 512)
    h = jnp.dot(h, w2_ref[...], preferred_element_type=jnp.float32)
    h = h + b2_ref[...]
    h = jnp.maximum(h, 0.0).astype(jnp.bfloat16)
    # Layer 3: Linear(512 -> 128 padded); padded lanes are zero in w3/b3.
    h = jnp.dot(h, w3_ref[...], preferred_element_type=jnp.float32)
    out_ref[...] = (h + b3_ref[...]).astype(out_ref.dtype)


def _select_batch_tile(B):
    """Padding-aware batch-tile choice.

    Tiny (acting-path) batches: one grid step, minimal (multiple-of-8) tile.
    Training batches: among {128, 256, 512, 1024} minimize padded rows first,
    then prefer a grid of >= 2 steps (v7x megacore can shard the "parallel"
    batch axis across both TensorCores), then the largest tile (fewest
    per-step pipeline overheads).
    """
    if B <= 128:
        return _round_up(max(B, 1), 8)

    candidates = (128, 256, 512, 1024)

    def score(tb):
        bp = _round_up(B, tb)
        steps = bp // tb
        return (bp, 0 if steps >= 2 else 1, -tb)

    return min(candidates, key=score)


def dqn_forward(x, params, out_dim, *, batch_tile=None):
    """x: [B, state_dim] float32/bfloat16. Returns [B, out_dim] float32
    (out_dim = NUM_GAMMAS * action_dim)."""
    w1, b1, w2, b2, w3, b3 = params
    B, state_dim = x.shape
    out_pad = w3.shape[1]  # 128

    TB = batch_tile if batch_tile is not None else _select_batch_tile(B)
    Bp = _round_up(B, TB)

    # bf16 input: halves the per-step x DMA; matmul operands are bf16 anyway.
    x = x.astype(jnp.bfloat16)
    if Bp != B:
        x = jnp.pad(x, ((0, Bp - B), (0, 0)))

    grid = (Bp // TB,)

    flops = 2 * Bp * (state_dim * HIDDEN + HIDDEN * HIDDEN + HIDDEN * out_pad)
    bytes_accessed = (
        x.size * x.dtype.itemsize
        + sum(p.size * p.dtype.itemsize for p in params)
        + Bp * out_pad * 4
    )

    out = pl.pallas_call(
        dqn_kernel,
        out_shape=jax.ShapeDtypeStruct((Bp, out_pad), jnp.float32),
        grid_spec=pltpu.PrefetchScalarGridSpec(
            num_scalar_prefetch=0,
            grid=grid,
            in_specs=[
                pl.BlockSpec((TB, state_dim), lambda i: (i, 0)),       # x tile
                pl.BlockSpec((state_dim, HIDDEN), lambda i: (0, 0)),   # w1 (pinned)
                pl.BlockSpec((1, HIDDEN), lambda i: (0, 0)),           # b1
                pl.BlockSpec((HIDDEN, HIDDEN), lambda i: (0, 0)),      # w2 (pinned)
                pl.BlockSpec((1, HIDDEN), lambda i: (0, 0)),           # b2
                pl.BlockSpec((HIDDEN, out_pad), lambda i: (0, 0)),     # w3 (pinned)
                pl.BlockSpec((1, out_pad), lambda i: (0, 0)),          # b3
            ],
            out_specs=pl.BlockSpec((TB, out_pad), lambda i: (i, 0)),
        ),
        compiler_params=pltpu.CompilerParams(
            dimension_semantics=("parallel",)),
        cost_estimate=pl.CostEstimate(
            flops=flops, transcendentals=0, bytes_accessed=bytes_accessed),
    )(x, w1, b1, w2, b2, w3, b3)

    return out[:B, :out_dim]


def init_params(key, state_dim, action_dim):
    """PyTorch nn.Linear-style init (U(-1/sqrt(fan_in), +)); weights stored
    pre-transposed as [in, out], bf16, final layer zero-padded to 128 lanes."""
    out_dim = NUM_GAMMAS * action_dim
    dims = [(state_dim, HIDDEN), (HIDDEN, HIDDEN), (HIDDEN, out_dim)]
    raw = []
    for fan_in, fan_out in dims:
        kw, kb, key = jax.random.split(key, 3)
        bound = 1.0 / math.sqrt(fan_in)
        w = jax.random.uniform(kw, (fan_in, fan_out), jnp.float32, -bound, bound)
        b = jax.random.uniform(kb, (1, fan_out), jnp.float32, -bound, bound)
        raw.extend([w, b])
    w1, b1, w2, b2, w3, b3 = raw
    pad = OUT_PAD - out_dim
    w3 = jnp.pad(w3, ((0, 0), (0, pad)))
    b3 = jnp.pad(b3, ((0, 0), (0, pad)))
    # Weights in bf16 (halves HBM traffic, MXU-native); biases stay f32.
    return (w1.astype(jnp.bfloat16), b1,
            w2.astype(jnp.bfloat16), b2,
            w3.astype(jnp.bfloat16), b3)


def dqn_reference_bf16(x, params, out_dim):
    """Pure-JAX reference using the kernel's exact bf16-operand / f32-acc recipe."""
    w1, b1, w2, b2, w3, b3 = params
    h = jnp.dot(x.astype(jnp.bfloat16), w1, preferred_element_type=jnp.float32) + b1
    h = jnp.maximum(h, 0.0).astype(jnp.bfloat16)
    h = jnp.dot(h, w2, preferred_element_type=jnp.float32) + b2
    h = jnp.maximum(h, 0.0).astype(jnp.bfloat16)
    h = jnp.dot(h, w3, preferred_element_type=jnp.float32) + b3
    return h[:, :out_dim]


def dqn_reference_f32(x, params, out_dim):
    """All-f32 reference (weights upcast) to bound bf16 drift vs a true
    PyTorch f32 forward."""
    w1, b1, w2, b2, w3, b3 = params
    h = jnp.dot(x, w1.astype(jnp.float32), preferred_element_type=jnp.float32) + b1
    h = jnp.maximum(h, 0.0)
    h = jnp.dot(h, w2.astype(jnp.float32), preferred_element_type=jnp.float32) + b2
    h = jnp.maximum(h, 0.0)
    h = jnp.dot(h, w3.astype(jnp.float32), preferred_element_type=jnp.float32) + b3
    return h[:, :out_dim]


if __name__ == "__main__":
    state_dim = 8    # LunarLander observation dim
    action_dim = 4   # LunarLander action dim
    out_dim = NUM_GAMMAS * action_dim  # 100

    key = jax.random.PRNGKey(0)
    k_x1, k_x2, k_p = jax.random.split(key, 3)
    params = init_params(k_p, state_dim, action_dim)

    # Acting-path shape: tiny batch, single grid step (TB=8).
    x_small = jax.random.normal(k_x1, (8, state_dim), jnp.float32)
    out_small = jax.block_until_ready(dqn_forward(x_small, params, out_dim))
    assert out_small.shape == (8, out_dim), out_small.shape

    ref_b = dqn_reference_bf16(x_small, params, out_dim)
    assert jnp.allclose(out_small, ref_b, atol=2e-2, rtol=2e-2), \
        float(jnp.max(jnp.abs(out_small - ref_b)))
    ref_f = dqn_reference_f32(x_small, params, out_dim)
    assert jnp.allclose(out_small, ref_f, atol=5e-2, rtol=5e-2), \
        float(jnp.max(jnp.abs(out_small - ref_f)))

    # Training-path shape: non-multiple batch exercises the padding-aware
    # tiling (B=300 -> TB=128, Bp=384, 3 grid steps) and batch padding.
    x_train = jax.random.normal(k_x2, (300, state_dim), jnp.float32)
    out_train = jax.block_until_ready(dqn_forward(x_train, params, out_dim))
    assert out_train.shape == (300, out_dim), out_train.shape
    ref_t = dqn_reference_bf16(x_train, params, out_dim)
    assert jnp.allclose(out_train, ref_t, atol=2e-2, rtol=2e-2), \
        float(jnp.max(jnp.abs(out_train - ref_t)))

    print("KERNEL_OK")
</pallas_src>

<mosaic_0001>
module attributes {stable_mosaic.version = 11 : i64} {
  func.func @dqn_kernel(%arg0: i32, %arg1: memref<8x8xbf16, #tpu.memory_space<vmem>>, %arg2: memref<8x512xbf16, #tpu.memory_space<vmem>>, %arg3: memref<1x512xf32, #tpu.memory_space<vmem>>, %arg4: memref<512x512xbf16, #tpu.memory_space<vmem>>, %arg5: memref<1x512xf32, #tpu.memory_space<vmem>>, %arg6: memref<512x128xbf16, #tpu.memory_space<vmem>>, %arg7: memref<1x128xf32, #tpu.memory_space<vmem>>, %arg8: memref<8x128xf32, #tpu.memory_space<vmem>>) attributes {dimension_semantics = [#tpu.dimension_semantics<parallel>], iteration_bounds = array<i64: 1>, scalar_prefetch = 0 : i64, scratch_operands = 0 : i64, tpu.core_type = #tpu.core_type<tc>, window_params = [{transform_indices = @transform_0, window_bounds = array<i64: 8, 8>}, {pipeline_mode = #tpu.pipeline_mode<synchronous>, transform_indices = @transform_1, window_bounds = array<i64: 8, 512>}, {pipeline_mode = #tpu.pipeline_mode<synchronous>, transform_indices = @transform_2, window_bounds = array<i64: 1, 512>}, {pipeline_mode = #tpu.pipeline_mode<synchronous>, transform_indices = @transform_3, window_bounds = array<i64: 512, 512>}, {pipeline_mode = #tpu.pipeline_mode<synchronous>, transform_indices = @transform_4, window_bounds = array<i64: 1, 512>}, {pipeline_mode = #tpu.pipeline_mode<synchronous>, transform_indices = @transform_5, window_bounds = array<i64: 512, 128>}, {pipeline_mode = #tpu.pipeline_mode<synchronous>, transform_indices = @transform_6, window_bounds = array<i64: 1, 128>}, {transform_indices = @transform_7, window_bounds = array<i64: 8, 128>}]} {
    %c0 = arith.constant 0 : index
    %c0_0 = arith.constant 0 : index
    %0 = vector.load %arg1[%c0, %c0_0] : memref<8x8xbf16, #tpu.memory_space<vmem>>, vector<8x8xbf16>
    %c0_1 = arith.constant 0 : index
    %c0_2 = arith.constant 0 : index
    %1 = vector.load %arg2[%c0_1, %c0_2] : memref<8x512xbf16, #tpu.memory_space<vmem>>, vector<8x512xbf16>
    %cst = arith.constant dense<0.000000e+00> : vector<8x512xf32>
    %2 = tpu.matmul %0, %1, %cst {dimension_numbers = #tpu.dot_dimension_numbers<[1], [0], [0], [1], [0, 0, 1, 1], [], []>} : vector<8x8xbf16>, vector<8x512xbf16>, vector<8x512xf32> -> vector<8x512xf32>
    %c0_3 = arith.constant 0 : index
    %c0_4 = arith.constant 0 : index
    %3 = vector.load %arg3[%c0_3, %c0_4] : memref<1x512xf32, #tpu.memory_space<vmem>>, vector<1x512xf32>
    %4 = vector.broadcast %3 : vector<1x512xf32> to vector<8x512xf32>
    %5 = arith.addf %2, %4 : vector<8x512xf32>
    %cst_5 = arith.constant 0.000000e+00 : f32
    %6 = vector.broadcast %cst_5 : f32 to vector<8x512xf32>
    %7 = arith.maximumf %5, %6 : vector<8x512xf32>
    %8 = arith.truncf %7 : vector<8x512xf32> to vector<8x512xbf16>
    %c0_6 = arith.constant 0 : index
    %c0_7 = arith.constant 0 : index
    %9 = vector.load %arg4[%c0_6, %c0_7] : memref<512x512xbf16, #tpu.memory_space<vmem>>, vector<512x512xbf16>
    %cst_8 = arith.constant dense<0.000000e+00> : vector<8x512xf32>
    %10 = tpu.matmul %8, %9, %cst_8 {dimension_numbers = #tpu.dot_dimension_numbers<[1], [0], [0], [1], [0, 0, 1, 1], [], []>} : vector<8x512xbf16>, vector<512x512xbf16>, vector<8x512xf32> -> vector<8x512xf32>
    %c0_9 = arith.constant 0 : index
    %c0_10 = arith.constant 0 : index
    %11 = vector.load %arg5[%c0_9, %c0_10] : memref<1x512xf32, #tpu.memory_space<vmem>>, vector<1x512xf32>
    %12 = vector.broadcast %11 : vector<1x512xf32> to vector<8x512xf32>
    %13 = arith.addf %10, %12 : vector<8x512xf32>
    %cst_11 = arith.constant 0.000000e+00 : f32
    %14 = vector.broadcast %cst_11 : f32 to vector<8x512xf32>
    %15 = arith.maximumf %13, %14 : vector<8x512xf32>
    %16 = arith.truncf %15 : vector<8x512xf32> to vector<8x512xbf16>
    %c0_12 = arith.constant 0 : index
    %c0_13 = arith.constant 0 : index
    %17 = vector.load %arg6[%c0_12, %c0_13] : memref<512x128xbf16, #tpu.memory_space<vmem>>, vector<512x128xbf16>
    %cst_14 = arith.constant dense<0.000000e+00> : vector<8x128xf32>
    %18 = tpu.matmul %16, %17, %cst_14 {dimension_numbers = #tpu.dot_dimension_numbers<[1], [0], [0], [1], [0, 0, 1, 1], [], []>} : vector<8x512xbf16>, vector<512x128xbf16>, vector<8x128xf32> -> vector<8x128xf32>
    %c0_15 = arith.constant 0 : index
    %c0_16 = arith.constant 0 : index
    %19 = vector.load %arg7[%c0_15, %c0_16] : memref<1x128xf32, #tpu.memory_space<vmem>>, vector<1x128xf32>
    %20 = vector.broadcast %19 : vector<1x128xf32> to vector<8x128xf32>
    %21 = arith.addf %18, %20 : vector<8x128xf32>
    %c0_17 = arith.constant 0 : index
    %c0_18 = arith.constant 0 : index
    %22 = vector.load %arg8[%c0_17, %c0_18] : memref<8x128xf32, #tpu.memory_space<vmem>>, vector<8x128xf32>
    tpu.vector_store %arg8[%c0_17, %c0_18], %21 {strides = array<i32>} : memref<8x128xf32, #tpu.memory_space<vmem>>, vector<8x128xf32>,
    return
  }
  func.func @transform_0(%arg0: i32) -> (i32, i32) {
    %c0_i32 = arith.constant 0 : i32
    %c0_i32_0 = arith.constant 0 : i32
    return %arg0, %c0_i32 : i32, i32
  }
  func.func @transform_1(%arg0: i32) -> (i32, i32) {
    %c0_i32 = arith.constant 0 : i32
    %c0_i32_0 = arith.constant 0 : i32
    %c0_i32_1 = arith.constant 0 : i32
    return %c0_i32, %c0_i32_0 : i32, i32
  }
  func.func @transform_2(%arg0: i32) -> (i32, i32) {
    %c0_i32 = arith.constant 0 : i32
    %c0_i32_0 = arith.constant 0 : i32
    %c0_i32_1 = arith.constant 0 : i32
    return %c0_i32, %c0_i32_0 : i32, i32
  }
  func.func @transform_3(%arg0: i32) -> (i32, i32) {
    %c0_i32 = arith.constant 0 : i32
    %c0_i32_0 = arith.constant 0 : i32
    %c0_i32_1 = arith.constant 0 : i32
    return %c0_i32, %c0_i32_0 : i32, i32
  }
  func.func @transform_4(%arg0: i32) -> (i32, i32) {
    %c0_i32 = arith.constant 0 : i32
    %c0_i32_0 = arith.constant 0 : i32
    %c0_i32_1 = arith.constant 0 : i32
    return %c0_i32, %c0_i32_0 : i32, i32
  }
  func.func @transform_5(%arg0: i32) -> (i32, i32) {
    %c0_i32 = arith.constant 0 : i32
    %c0_i32_0 = arith.constant 0 : i32
    %c0_i32_1 = arith.constant 0 : i32
    return %c0_i32, %c0_i32_0 : i32, i32
  }
  func.func @transform_6(%arg0: i32) -> (i32, i32) {
    %c0_i32 = arith.constant 0 : i32
    %c0_i32_0 = arith.constant 0 : i32
    %c0_i32_1 = arith.constant 0 : i32
    return %c0_i32, %c0_i32_0 : i32, i32
  }
  func.func @transform_7(%arg0: i32) -> (i32, i32) {
    %c0_i32 = arith.constant 0 : i32
    %c0_i32_0 = arith.constant 0 : i32
    return %arg0, %c0_i32 : i32, i32
  }
}

</mosaic_0001>

<bundles_post_ra>
// kernel: tpu_custom_call.1
= control target key start
LH: loop header
LB: loop body
LE: loop exit
PB: predicated region body
PF: predicated region fallthrough
CT: control target
= control target key end

     0   :  { %12 = vsyncpa [#allocation3], 0  ;;  %s2648_s0 = inlined_call_operand.hbm [shape: bf16[8,8], index: 0, kind: input, shape index: {}]   ;;  %s2649_s1 = inlined_call_operand.hbm [shape: bf16[8,512], index: 1, kind: input, shape index: {}]   ;;  %s2650_s2 = inlined_call_operand.hbm [shape: f32[1,512], index: 2, kind: input, shape index: {}]   ;;  %s2651_s3 = inlined_call_operand.hbm [shape: bf16[512,512], index: 3, kind: input, shape index: {}]   ;;  %s2652_s4 = inlined_call_operand.hbm [shape: f32[1,512], index: 4, kind: input, shape index: {}]   ;;  %s2653_s5 = inlined_call_operand.hbm [shape: bf16[512,128], index: 5, kind: input, shape index: {}]   ;;  %s2654_s6 = inlined_call_operand.vmem [shape: f32[1,128], index: 6, kind: input, shape index: {}]   ;;  %s2655_s7 = inlined_call_operand.hbm [shape: f32[8,128], index: 7, kind: output, shape index: {}]  }
   0x1   :  { %13 = vsyncpa [#allocation6], 0 }
   0x2   :  { %14 = vsyncpa [#allocation9], 0 }
   0x3   :  { %15 = vsyncpa [#allocation12], 0  ;;  %s33_s26 = sshll.u32 %s2649_s1, 4  ;;  %s34_s26 = int_to_ptr.hbm [resolvable:$true] %s33_s26 }
   0x4   :  { %16 = vsyncpa [#allocation4], 0  ;;  %s2535_s27 = smov [#allocation5]   ;;  %s54_s8 = sshll.u32 %s2651_s3, 4  ;;  %s55_s8 = int_to_ptr.hbm [resolvable:$true] %s54_s8 }
   0x5   :  { %s35_s28 = sshll.u32 %s2535_s27, 4  ;;  %s2536_s9 = smov [#allocation8]   ;;  %s36_s28 = int_to_ptr.vmem [resolvable:$true] %s35_s28 }
   0x6   :  { %38 = dma.hbm_to_vmem [thread:$0]  %s34_s26, 256, %s36_s28, [#allocation6]  }
   0x7   :  { %s56_s10 = sshll.u32 %s2536_s9, 4  ;;  %s2537_s11 = smov 256   ;;  %s57_s10 = int_to_ptr.vmem [resolvable:$true] %s56_s10 }
   0x8   :  { %s2538_s12 = smov 16   ;;  %s22_s1 = sshll.u32 %s2648_s0, 4  ;;  %s23_s1 = int_to_ptr.hbm [resolvable:$true] %s22_s1 }
   0x9   :  { %62 = dma.hbm_to_vmem [thread:$0]  %s55_s8, 16384, %s57_s10, [#allocation9], %s2537_s11, %s2537_s11, %s2538_s12  }
   0xa   :  { %s2539_s15 = smov [#allocation2]   ;;  %s44_s3 = sshll.u32 %s2650_s2, 4  ;;  %s45_s3 = int_to_ptr.hbm [resolvable:$true] %s44_s3 }
   0xb   :  { %s24_s16 = sshll.u32 %s2539_s15, 4  ;;  %s2540_s19 = smov [#allocation7]   ;;  %s25_s16 = int_to_ptr.vmem [resolvable:$true] %s24_s16 }
   0xc   :  { %27 = dma.hbm_to_vmem [thread:$0]  %s23_s1, 64, %s25_s16, [#allocation3]  }
   0xd   :  { %s46_s20 = sshll.u32 %s2540_s19, 4  ;;  %s68_s23 = sshll.u32 %s2652_s4, 4  ;;  %s47_s20 = int_to_ptr.vmem [resolvable:$true] %s46_s20  ;;  %s69_s23 = int_to_ptr.hbm [resolvable:$true] %s68_s23 }
   0xe   :  { %49 = dma.hbm_to_vmem [thread:$0]  %s45_s3, 64, %s47_s20, [#allocation6]  }
   0xf   :  { %s78_s25 = sshll.u32 %s2653_s5, 4  ;;  %s2541_s26 = smov [#allocation10]   ;;  %s79_s25 = int_to_ptr.hbm [resolvable:$true] %s78_s25 }
  0x10   :  { %s70_s27 = sshll.u32 %s2541_s26, 4  ;;  %s2542_s2 = smov [#allocation11]   ;;  %s71_s27 = int_to_ptr.vmem [resolvable:$true] %s70_s27 }
  0x11   :  { %73 = dma.hbm_to_vmem [thread:$0]  %s69_s23, 64, %s71_s27, [#allocation9]  }
  0x12   :  { %s80_s28 = sshll.u32 %s2542_s2, 4  ;;  %s2543_s29 = smov 64   ;;  %s81_s28 = int_to_ptr.vmem [resolvable:$true] %s80_s28 }
  0x13   :  { %s2544_s30 = smov 4  }
  0x14   :  { %86 = dma.hbm_to_vmem [thread:$0]  %s79_s25, 4096, %s81_s28, [#allocation12], %s2543_s29, %s2543_s29, %s2544_s30  }
  0x15   :  { %2525 = dma.done.wait [#allocation3], 64  }
  0x16   :  { %2526 = vsyncadd [#allocation3], 4294967232 }
  0x17   :  { %2527 = dma.done.wait [#allocation6], 320  }
  0x18   :  { %2528 = vsyncadd [#allocation6], 4294966976 }
  0x19   :  { %2529 = dma.done.wait [#allocation9], 16448  }
  0x1a   :  { %2530 = vsyncadd [#allocation9], 4294950848 }
  0x1b   :  { %2531 = dma.done.wait [#allocation12], 4096  }
  0x1c   :  { %2532 = vsyncadd [#allocation12], 4294963200  ;;  %v115_v0 = vld [vmem:[#allocation5] sm:$0xff]  ;;  %v116_v1 = vld [vmem:[#allocation5 + $0x8] sm:$0xff]  ;;  %vm141_vm0 = vcmask 1043456   ;;  %vm137_vm1 = vcmask 64512  }
  0x1d   :  { %v129_v2 = vunpack.c.l.b16 %v115_v0  ;;  %v130_v3 = vunpack.c.h.b16 %v115_v0  ;;  %v131_v4 = vunpack.c.l.b16 %v116_v1  ;;  %v132_v5 = vunpack.c.h.b16 %v116_v1  ;;  %v1659_v6 = vld [vmem:[#allocation8 + $0xe0] sm:$0xf]  ;;  %v2215_v7 = vld [vmem:[#allocation8 + $0xec] sm:$0xf0]  ;;  %v114_v28 = vld [vmem:[#allocation2] sm:$0xf] }
  0x1e   :  { %v1787_v8 = vld [vmem:[#allocation8 + $0x1e0] sm:$0xf]  ;;  %v2247_v9 = vld [vmem:[#allocation8 + $0x1ec] sm:$0xf0]  ;;  %v1660_v18 = vor.u32 %v2215_v7, %v1659_v6  ;;  %s2545_s8 = smov [#allocation13]   ;;  %s1528_s12 = sshll.u32 %s2655_s7, 4  ;;  %s1529_s12 = int_to_ptr.hbm [resolvable:$true] %s1528_s12 }
  0x1f   :  { %v133_v10 = vpack.c.b16 %v129_v2, %v129_v2  ;;  %v134_v11 = vpack.c.b16 %v130_v3, %v130_v3  ;;  %v135_v12 = vpack.c.b16 %v131_v4, %v131_v4  ;;  %v136_v13 = vpack.c.b16 %v132_v5, %v132_v5  ;;  %v1643_v14 = vld [vmem:[#allocation8 + $0xc0] sm:$0xf]  ;;  %v2211_v15 = vld [vmem:[#allocation8 + $0xcc] sm:$0xf0]  ;;  %s1526_s9 = sshll.u32 %s2545_s8, 4  ;;  %s1527_s9 = int_to_ptr.vmem [resolvable:$true] %s1526_s9 }
  0x20   :  { %v1771_v16 = vld [vmem:[#allocation8 + $0x1c0] sm:$0xf]  ;;  %v1788_v19 = vor.u32 %v2247_v9, %v1787_v8  ;;  %v2279_v20 = vld [vmem:[#allocation8 + $0x2ec] sm:$0xf0]  ;;  %v1644_v33 = vor.u32 %v2211_v15, %v1643_v14 }
  0x21   :  { %v1915_v17 = vld [vmem:[#allocation8 + $0x2e0] sm:$0xf]  ;;  %v2311_v22 = vld [vmem:[#allocation8 + $0x3ec] sm:$0xf0]  ;;  %v143_v23 = vsel %vm141_vm0, %v133_v10, 0  ;;  %v146_v24 = vsel %vm141_vm0, %v134_v11, 0 }
  0x22   :  { %v2043_v21 = vld [vmem:[#allocation8 + $0x3e0] sm:$0xf]  ;;  %v149_v25 = vsel %vm141_vm0, %v135_v12, 0  ;;  %v152_v26 = vsel %vm141_vm0, %v136_v13, 0  ;;  %v2243_v27 = vld [vmem:[#allocation8 + $0x1cc] sm:$0xf0]  ;;  %161 = vmatpush.bf16.msra.mxu0 %v143_v23  ;;  %174 = vmatpush.bf16.msra.mxu1 %v146_v24  ;;  %v1916_v29 = vor.u32 %v2279_v20, %v1915_v17 }
  0x23   :  { %187 = vmatpush.bf16.msra.mxu2 %v149_v25  ;;  %200 = vmatpush.bf16.msra.mxu3 %v152_v26  ;;  %v2044_v30 = vor.u32 %v2311_v22, %v2043_v21  ;;  %v1627_v31 = vld [vmem:[#allocation8 + $0xa0] sm:$0xf]  ;;  %v1772_v34 = vor.u32 %v2243_v27, %v1771_v16  ;;  %v2275_v35 = vld [vmem:[#allocation8 + $0x2cc] sm:$0xf0] }
  0x24   :  { %v1899_v32 = vld [vmem:[#allocation8 + $0x2c0] sm:$0xf]  ;;  %v2307_v37 = vld [vmem:[#allocation8 + $0x3cc] sm:$0xf0] }
  0x25   :  { %v2027_v36 = vld [vmem:[#allocation8 + $0x3c0] sm:$0xf]  ;;  %1541 = vmatmul.msk.bf16.vlgmr.msra.gmra.mxu0 %vm137_vm1, %v114_v28  ;;  %1542 = vmatmul.msk.bf16.vlgmr.msra.gmra.mxu1 %vm137_vm1, %v114_v28  ;;  %v2207_v38 = vld [vmem:[#allocation8 + $0xac] sm:$0xf0]  ;;  %v1900_v41 = vor.u32 %v2275_v35, %v1899_v32 }
  0x26   :  { %992 = vmatpush.bf16.msrb.mxu0 %v1660_v18  ;;  %1005 = vmatpush.bf16.msrb.mxu1 %v1788_v19  ;;  %v1755_v39 = vld [vmem:[#allocation8 + $0x1a0] sm:$0xf]  ;;  %v2239_v40 = vld [vmem:[#allocation8 + $0x1ac] sm:$0xf0]  ;;  %v2028_v42 = vor.u32 %v2307_v37, %v2027_v36  ;;  %v1628_v45 = vor.u32 %v2207_v38, %v1627_v31  ;;  %v2213_v37 = vld [vmem:[#allocation8 + $0xe4] sm:$0xf] }
  0x27   :  { %1543 = vmatmul.msk.bf16.vlgmr.msra.gmra.mxu2 %vm137_vm1, %v114_v28  ;;  %1544 = vmatmul.msk.bf16.vlgmr.msra.gmra.mxu3 %vm137_vm1, %v114_v28  ;;  %v1611_v43 = vld [vmem:[#allocation8 + $0x80] sm:$0xf]  ;;  %v1756_v46 = vor.u32 %v2239_v40, %v1755_v39  ;;  %v2271_v47 = vld [vmem:[#allocation8 + $0x2ac] sm:$0xf0]  ;;  %v1661_v38 = vld [vmem:[#allocation8 + $0xf0] sm:$0xf0] }
  0x28   :  { %1018 = vmatpush.bf16.msrb.mxu2 %v1916_v29  ;;  %1031 = vmatpush.bf16.msrb.mxu3 %v2044_v30  ;;  %v1883_v44 = vld [vmem:[#allocation8 + $0x2a0] sm:$0xf]  ;;  %v2303_v49 = vld [vmem:[#allocation8 + $0x3ac] sm:$0xf0]  ;;  %v2245_v39 = vld [vmem:[#allocation8 + $0x1e4] sm:$0xf] }
  0x29   :  { %v2011_v48 = vld [vmem:[#allocation8 + $0x3a0] sm:$0xf]  ;;  %v2203_v50 = vld [vmem:[#allocation8 + $0x8c] sm:$0xf0]  ;;  %v1884_v53 = vor.u32 %v2271_v47, %v1883_v44  ;;  %v1789_v40 = vld [vmem:[#allocation8 + $0x1f0] sm:$0xf0] }
  0x2a   :  { %993 = vmatpush.bf16.msrb.mxu0 %v1644_v33  ;;  %1006 = vmatpush.bf16.msrb.mxu1 %v1772_v34  ;;  %v1739_v51 = vld [vmem:[#allocation8 + $0x180] sm:$0xf]  ;;  %v2235_v52 = vld [vmem:[#allocation8 + $0x18c] sm:$0xf0]  ;;  %v2012_v54 = vor.u32 %v2303_v49, %v2011_v48  ;;  %v1612_v57 = vor.u32 %v2203_v50, %v1611_v43  ;;  %v2209_v47 = vld [vmem:[#allocation8 + $0xc4] sm:$0xf] }
  0x2b   :  { %v1595_v55 = vld [vmem:[#allocation8 + $0x60] sm:$0xf]  ;;  %v1740_v58 = vor.u32 %v2235_v52, %v1739_v51  ;;  %v2267_v59 = vld [vmem:[#allocation8 + $0x28c] sm:$0xf0]  ;;  %v2277_v50 = vld [vmem:[#allocation8 + $0x2e4] sm:$0xf]  ;;  %v1664_v51 = vor.u32 %v2213_v37, %v1661_v38  ;;  %v1792_v52 = vor.u32 %v2245_v39, %v1789_v40 }
  0x2c   :  { %1019 = vmatpush.bf16.msrb.mxu2 %v1900_v41  ;;  %1032 = vmatpush.bf16.msrb.mxu3 %v2028_v42  ;;  %v1867_v56 = vld [vmem:[#allocation8 + $0x280] sm:$0xf]  ;;  %v2299_v61 = vld [vmem:[#allocation8 + $0x38c] sm:$0xf0]  ;;  %v2193_v37 = vld [vmem:[#allocation8 + $0x44] sm:$0xf] }
  0x2d   :  { %v1995_v60 = vld [vmem:[#allocation8 + $0x380] sm:$0xf]  ;;  %v2199_v62 = vld [vmem:[#allocation8 + $0x6c] sm:$0xf0]  ;;  %v1868_v1 = vor.u32 %v2267_v59, %v1867_v56  ;;  %v1645_v56 = vld [vmem:[#allocation8 + $0xd0] sm:$0xf0] }
  0x2e   :  { %994 = vmatpush.bf16.msrb.mxu0 %v1628_v45  ;;  %1007 = vmatpush.bf16.msrb.mxu1 %v1756_v46  ;;  %v1723_v63 = vld [vmem:[#allocation8 + $0x160] sm:$0xf]  ;;  %v2231_v0 = vld [vmem:[#allocation8 + $0x16c] sm:$0xf0]  ;;  %v1996_v2 = vor.u32 %v2299_v61, %v1995_v60  ;;  %v1596_v5 = vor.u32 %v2199_v62, %v1595_v55  ;;  %v2045_v55 = vld [vmem:[#allocation8 + $0x3f0] sm:$0xf0] }
  0x2f   :  { %v1579_v3 = vld [vmem:[#allocation8 + $0x40] sm:$0xf]  ;;  %v1724_v6 = vor.u32 %v2231_v0, %v1723_v63  ;;  %v2263_v7 = vld [vmem:[#allocation8 + $0x26c] sm:$0xf0]  ;;  %v2205_v63 = vld [vmem:[#allocation8 + $0xa4] sm:$0xf] }
  0x30   :  { %1020 = vmatpush.bf16.msrb.mxu2 %v1884_v53  ;;  %1033 = vmatpush.bf16.msrb.mxu3 %v2012_v54  ;;  %v1851_v4 = vld [vmem:[#allocation8 + $0x260] sm:$0xf]  ;;  %v2295_v9 = vld [vmem:[#allocation8 + $0x36c] sm:$0xf0]  ;;  %v1917_v53 = vld [vmem:[#allocation8 + $0x2f0] sm:$0xf0] }
  0x31   :  { %v1979_v8 = vld [vmem:[#allocation8 + $0x360] sm:$0xf]  ;;  %v2195_v10 = vld [vmem:[#allocation8 + $0x4c] sm:$0xf0]  ;;  %v1852_v13 = vor.u32 %v2263_v7, %v1851_v4  ;;  %v2309_v54 = vld [vmem:[#allocation8 + $0x3e4] sm:$0xf]  ;;  %v1920_v61 = vor.u32 %v2277_v50, %v1917_v53 }
  0x32   :  { %995 = vmatpush.bf16.msrb.mxu0 %v1612_v57  ;;  %1008 = vmatpush.bf16.msrb.mxu1 %v1740_v58  ;;  %v1707_v11 = vld [vmem:[#allocation8 + $0x140] sm:$0xf]  ;;  %v2227_v12 = vld [vmem:[#allocation8 + $0x14c] sm:$0xf0]  ;;  %v1980_v14 = vor.u32 %v2295_v9, %v1979_v8  ;;  %v1580_v17 = vor.u32 %v2195_v10, %v1579_v3  ;;  %v2241_v57 = vld [vmem:[#allocation8 + $0x1c4] sm:$0xf]  ;;  %v2048_v62 = vor.u32 %v2309_v54, %v2045_v55 }
  0x33   :  { %v1563_v15 = vld [vmem:[#allocation8 + $0x20] sm:$0xf]  ;;  %v1708_v18 = vor.u32 %v2227_v12, %v1707_v11  ;;  %v2259_v19 = vld [vmem:[#allocation8 + $0x24c] sm:$0xf0]  ;;  %v1773_v58 = vld [vmem:[#allocation8 + $0x1d0] sm:$0xf0] }
  0x34   :  { %1021 = vmatpush.bf16.msrb.mxu2 %v1868_v1  ;;  %1034 = vmatpush.bf16.msrb.mxu3 %v1996_v2  ;;  %v1835_v16 = vld [vmem:[#allocation8 + $0x240] sm:$0xf]  ;;  %v2291_v21 = vld [vmem:[#allocation8 + $0x34c] sm:$0xf0]  ;;  %v2273_v0 = vld [vmem:[#allocation8 + $0x2c4] sm:$0xf]  ;;  %v1648_v1 = vor.u32 %v2209_v47, %v1645_v56  ;;  %v1776_v2 = vor.u32 %v2241_v57, %v1773_v58 }
  0x35   :  { %v1963_v20 = vld [vmem:[#allocation8 + $0x340] sm:$0xf]  ;;  %v2191_v22 = vld [vmem:[#allocation8 + $0x2c] sm:$0xf0]  ;;  %v1836_v25 = vor.u32 %v2259_v19, %v1835_v16  ;;  %v1901_v3 = vld [vmem:[#allocation8 + $0x2d0] sm:$0xf0] }
  0x36   :  { %996 = vmatpush.bf16.msrb.mxu0 %v1596_v5  ;;  %1009 = vmatpush.bf16.msrb.mxu1 %v1724_v6  ;;  %v1691_v23 = vld [vmem:[#allocation8 + $0x120] sm:$0xf]  ;;  %v2223_v24 = vld [vmem:[#allocation8 + $0x12c] sm:$0xf0]  ;;  %v1964_v26 = vor.u32 %v2291_v21, %v1963_v20  ;;  %v1564_v30 = vor.u32 %v2191_v22, %v1563_v15  ;;  %v2305_v4 = vld [vmem:[#allocation8 + $0x3c4] sm:$0xf]  ;;  %v1904_v9 = vor.u32 %v2273_v0, %v1901_v3 }
  0x37   :  { %v1547_v27 = vld [vmem:[#allocation8] sm:$0xf]  ;;  %v2187_v28 = vld [vmem:[#allocation8 + $0xc] sm:$0xf0]  ;;  %v1692_v31 = vor.u32 %v2223_v24, %v1691_v23  ;;  %v2029_v5 = vld [vmem:[#allocation8 + $0x3d0] sm:$0xf0] }
  0x38   :  { %1022 = vmatpush.bf16.msrb.mxu2 %v1852_v13  ;;  %1035 = vmatpush.bf16.msrb.mxu3 %v1980_v14  ;;  %v1819_v29 = vld [vmem:[#allocation8 + $0x220] sm:$0xf]  ;;  %v2255_v32 = vld [vmem:[#allocation8 + $0x22c] sm:$0xf0]  ;;  %v1548_v45 = vor.u32 %v2187_v28, %v1547_v27  ;;  %v1629_v6 = vld [vmem:[#allocation8 + $0xb0] sm:$0xf0]  ;;  %v2032_v10 = vor.u32 %v2305_v4, %v2029_v5 }
  0x39   :  { %v1947_v33 = vld [vmem:[#allocation8 + $0x320] sm:$0xf]  ;;  %v2287_v34 = vld [vmem:[#allocation8 + $0x32c] sm:$0xf0]  ;;  %v1820_v41 = vor.u32 %v2255_v32, %v1819_v29  ;;  %v2237_v7 = vld [vmem:[#allocation8 + $0x1a4] sm:$0xf]  ;;  %v1632_v13 = vor.u32 %v2205_v63, %v1629_v6 }
  0x3a   :  { %997 = vmatpush.bf16.msrb.mxu0 %v1580_v17  ;;  %1010 = vmatpush.bf16.msrb.mxu1 %v1708_v18  ;;  %v1675_v35 = vld [vmem:[#allocation8 + $0x100] sm:$0xf]  ;;  %v2219_v36 = vld [vmem:[#allocation8 + $0x10c] sm:$0xf0]  ;;  %v1948_v42 = vor.u32 %v2287_v34, %v1947_v33  ;;  %v1757_v8 = vld [vmem:[#allocation8 + $0x1b0] sm:$0xf0] }
  0x3b   :  { %v1803_v43 = vld [vmem:[#allocation8 + $0x200] sm:$0xf]  ;;  %v2251_v44 = vld [vmem:[#allocation8 + $0x20c] sm:$0xf0]  ;;  %v1676_v46 = vor.u32 %v2219_v36, %v1675_v35  ;;  %v2201_v11 = vld [vmem:[#allocation8 + $0x84] sm:$0xf]  ;;  %v1760_v14 = vor.u32 %v2237_v7, %v1757_v8 }
  0x3c   :  { %1023 = vmatpush.bf16.msrb.mxu2 %v1836_v25  ;;  %1036 = vmatpush.bf16.msrb.mxu3 %v1964_v26  ;;  %v1931_v48 = vld [vmem:[#allocation8 + $0x300] sm:$0xf]  ;;  %v2283_v49 = vld [vmem:[#allocation8 + $0x30c] sm:$0xf0]  ;;  %v1804_v59 = vor.u32 %v2251_v44, %v1803_v43  ;;  %v2269_v12 = vld [vmem:[#allocation8 + $0x2a4] sm:$0xf] }
  0x3d   :  { %v1932_v60 = vor.u32 %v2283_v49, %v1931_v48  ;;  %v1885_v15 = vld [vmem:[#allocation8 + $0x2b0] sm:$0xf0]  ;;  %v2301_v16 = vld [vmem:[#allocation8 + $0x3a4] sm:$0xf] }
  0x3e   :  { %998 = vmatpush.bf16.msrb.mxu0 %v1564_v30  ;;  %1011 = vmatpush.bf16.msrb.mxu1 %v1692_v31  ;;  %v2013_v17 = vld [vmem:[#allocation8 + $0x3b0] sm:$0xf0]  ;;  %v2233_v19 = vld [vmem:[#allocation8 + $0x184] sm:$0xf]  ;;  %v1888_v21 = vor.u32 %v2269_v12, %v1885_v15  ;;  %v117_v15 = vld [vmem:[#allocation7] sm:$0xf] }
  0x3f   :  { %v1613_v18 = vld [vmem:[#allocation8 + $0x90] sm:$0xf0]  ;;  %v2016_v22 = vor.u32 %v2301_v16, %v2013_v17  ;;  %v2197_v23 = vld [vmem:[#allocation8 + $0x64] sm:$0xf]  ;;  %v119_v16 = vperm.slane %v117_v15, 0  ;;  %v120_v17 = vperm.slane %v117_v15, 1 }
  0x40   :  { %1024 = vmatpush.bf16.msrb.mxu2 %v1820_v41  ;;  %1037 = vmatpush.bf16.msrb.mxu3 %v1948_v42  ;;  %v1741_v20 = vld [vmem:[#allocation8 + $0x190] sm:$0xf0]  ;;  %v2265_v24 = vld [vmem:[#allocation8 + $0x284] sm:$0xf]  ;;  %v1616_v25 = vor.u32 %v2201_v11, %v1613_v18 }
  0x41   :  { %v1744_v26 = vor.u32 %v2233_v19, %v1741_v20  ;;  %v1869_v27 = vld [vmem:[#allocation8 + $0x290] sm:$0xf0]  ;;  %v2297_v28 = vld [vmem:[#allocation8 + $0x384] sm:$0xf]  ;;  %v1667_v20 = vld [vmem:[#allocation8 + $0xe8] sm:$0xf] }
  0x42   :  { %999 = vmatpush.bf16.msrb.mxu0 %v1548_v45  ;;  %1012 = vmatpush.bf16.msrb.mxu1 %v1676_v46  ;;  %v1997_v29 = vld [vmem:[#allocation8 + $0x390] sm:$0xf0]  ;;  %v2229_v31 = vld [vmem:[#allocation8 + $0x164] sm:$0xf]  ;;  %v1872_v33 = vor.u32 %v2265_v24, %v1869_v27  ;;  %v1795_v24 = vld [vmem:[#allocation8 + $0x1e8] sm:$0xf] }
  0x43   :  { %v1597_v30 = vld [vmem:[#allocation8 + $0x70] sm:$0xf0]  ;;  %v2000_v34 = vor.u32 %v2297_v28, %v1997_v29  ;;  %v2225_v39 = vld [vmem:[#allocation8 + $0x144] sm:$0xf]  ;;  %v121_v28 = vperm.slane %v117_v15, 2  ;;  %v122_v29 = vperm.slane %v117_v15, 3 }
  0x44   :  { %1025 = vmatpush.bf16.msrb.mxu2 %v1804_v59  ;;  %1038 = vmatpush.bf16.msrb.mxu3 %v1932_v60  ;;  %v1725_v32 = vld [vmem:[#allocation8 + $0x170] sm:$0xf0]  ;;  %v1600_v35 = vor.u32 %v2197_v23, %v1597_v30  ;;  %v2261_v43 = vld [vmem:[#allocation8 + $0x264] sm:$0xf]  ;;  %v2216_v23 = vld [vmem:[#allocation8 + $0xf4] sm:$0xf0] }
  0x45   :  { %v1728_v36 = vor.u32 %v2229_v31, %v1725_v32  ;;  %v1581_v38 = vld [vmem:[#allocation8 + $0x50] sm:$0xf0]  ;;  %v2293_v45 = vld [vmem:[#allocation8 + $0x364] sm:$0xf]  ;;  %v1668_v30 = vor.u32 %v2216_v23, %v1667_v20  ;;  %v1651_v32 = vld [vmem:[#allocation8 + $0xc8] sm:$0xf] }
  0x46   :  { %1044 = vmatpush.bf16.msra.mxu0 %v1664_v51  ;;  %1057 = vmatpush.bf16.msra.mxu1 %v1792_v52  ;;  %v1709_v40 = vld [vmem:[#allocation8 + $0x150] sm:$0xf0]  ;;  %v1584_v41 = vor.u32 %v2193_v37, %v1581_v38  ;;  %v2189_v49 = vld [vmem:[#allocation8 + $0x24] sm:$0xf]  ;;  %v2244_v37 = vld [vmem:[#allocation8 + $0x1d4] sm:$0xf0] }
  0x47   :  { %v1712_v42 = vor.u32 %v2225_v39, %v1709_v40  ;;  %v1853_v44 = vld [vmem:[#allocation8 + $0x270] sm:$0xf0]  ;;  %v2221_v52 = vld [vmem:[#allocation8 + $0x124] sm:$0xf]  ;;  %v2304_v15 = vld [vmem:[#allocation8 + $0x3b4] sm:$0xf0] }
  0x48   :  { %1070 = vmatpush.bf16.msra.mxu2 %v1920_v61  ;;  %1083 = vmatpush.bf16.msra.mxu3 %v2048_v62  ;;  %v1856_v46 = vor.u32 %v2261_v43, %v1853_v44  ;;  %v1981_v47 = vld [vmem:[#allocation8 + $0x370] sm:$0xf0]  ;;  %v2257_v55 = vld [vmem:[#allocation8 + $0x244] sm:$0xf]  ;;  %v2051_v43 = vld [vmem:[#allocation8 + $0x3e8] sm:$0xf] }
  0x49   :  { %v1984_v48 = vor.u32 %v2293_v45, %v1981_v47  ;;  %v1565_v50 = vld [vmem:[#allocation8 + $0x30] sm:$0xf0]  ;;  %v2289_v57 = vld [vmem:[#allocation8 + $0x344] sm:$0xf]  ;;  %v2268_v23 = vld [vmem:[#allocation8 + $0x294] sm:$0xf0] }
  0x4a   :  { %1045 = vmatpush.bf16.msra.mxu0 %v1648_v1  ;;  %1058 = vmatpush.bf16.msra.mxu1 %v1776_v2  ;;  %v1568_v51 = vor.u32 %v2189_v49, %v1565_v50  ;;  %v1693_v53 = vld [vmem:[#allocation8 + $0x130] sm:$0xf0]  ;;  %v2185_v61 = vld [vmem:[#allocation8 + $0x4] sm:$0xf]  ;;  %v2312_v49 = vld [vmem:[#allocation8 + $0x3f4] sm:$0xf0] }
  0x4b   :  { %v1696_v54 = vor.u32 %v2221_v52, %v1693_v53  ;;  %v1837_v56 = vld [vmem:[#allocation8 + $0x250] sm:$0xf0]  ;;  %v2217_v63 = vld [vmem:[#allocation8 + $0x104] sm:$0xf]  ;;  %v1635_v50 = vld [vmem:[#allocation8 + $0xa8] sm:$0xf] }
  0x4c   :  { %1071 = vmatpush.bf16.msra.mxu2 %v1904_v9  ;;  %1084 = vmatpush.bf16.msra.mxu3 %v2032_v10  ;;  %v1840_v58 = vor.u32 %v2257_v55, %v1837_v56  ;;  %v1965_v59 = vld [vmem:[#allocation8 + $0x350] sm:$0xf0]  ;;  %v2253_v3 = vld [vmem:[#allocation8 + $0x224] sm:$0xf]  ;;  %v1763_v52 = vld [vmem:[#allocation8 + $0x1a8] sm:$0xf] }
  0x4d   :  { %v1968_v60 = vor.u32 %v2289_v57, %v1965_v59  ;;  %v1549_v62 = vld [vmem:[#allocation8 + $0x10] sm:$0xf0]  ;;  %v2285_v6 = vld [vmem:[#allocation8 + $0x324] sm:$0xf]  ;;  %v2240_v53 = vld [vmem:[#allocation8 + $0x1b4] sm:$0xf0]  ;;  %v2052_v57 = vor.u32 %v2312_v49, %v2051_v43 }
  0x4e   :  { %1046 = vmatpush.bf16.msra.mxu0 %v1632_v13  ;;  %1059 = vmatpush.bf16.msra.mxu1 %v1760_v14  ;;  %v1552_v0 = vor.u32 %v2185_v61, %v1549_v62  ;;  %v1677_v1 = vld [vmem:[#allocation8 + $0x110] sm:$0xf0]  ;;  %v2249_v9 = vld [vmem:[#allocation8 + $0x204] sm:$0xf]  ;;  %v1907_v59 = vld [vmem:[#allocation8 + $0x2c8] sm:$0xf] }
  0x4f   :  { %v1680_v2 = vor.u32 %v2217_v63, %v1677_v1  ;;  %v1821_v4 = vld [vmem:[#allocation8 + $0x230] sm:$0xf0]  ;;  %v2281_v12 = vld [vmem:[#allocation8 + $0x304] sm:$0xf]  ;;  %v1764_v63 = vor.u32 %v2240_v53, %v1763_v52  ;;  %v2308_v1 = vld [vmem:[#allocation8 + $0x3d4] sm:$0xf0] }
  0x50   :  { %1072 = vmatpush.bf16.msra.mxu2 %v1888_v21  ;;  %1085 = vmatpush.bf16.msra.mxu3 %v2016_v22  ;;  %v1824_v5 = vor.u32 %v2253_v3, %v1821_v4  ;;  %v1949_v7 = vld [vmem:[#allocation8 + $0x330] sm:$0xf0]  ;;  %v2204_v3 = vld [vmem:[#allocation8 + $0x94] sm:$0xf0]  ;;  %v1747_v4 = vld [vmem:[#allocation8 + $0x188] sm:$0xf] }
  0x51   :  { %v1952_v8 = vor.u32 %v2285_v6, %v1949_v7  ;;  %v1805_v10 = vld [vmem:[#allocation8 + $0x210] sm:$0xf0]  ;;  %v2192_v43 = vld [vmem:[#allocation8 + $0x34] sm:$0xf0] }
  0x52   :  { %1047 = vmatpush.bf16.msra.mxu0 %v1616_v25  ;;  %1060 = vmatpush.bf16.msra.mxu1 %v1744_v26  ;;  %v1808_v11 = vor.u32 %v2249_v9, %v1805_v10  ;;  %v1933_v13 = vld [vmem:[#allocation8 + $0x310] sm:$0xf0]  ;;  %v2248_v25 = vld [vmem:[#allocation8 + $0x1f4] sm:$0xf0]  ;;  %v1891_v10 = vld [vmem:[#allocation8 + $0x2a8] sm:$0xf] }
  0x53   :  { %v1936_v14 = vor.u32 %v2281_v12, %v1933_v13  ;;  %v1796_v31 = vor.u32 %v2248_v25, %v1795_v24  ;;  %v2272_v13 = vld [vmem:[#allocation8 + $0x2b4] sm:$0xf0]  ;;  %v2003_v24 = vld [vmem:[#allocation8 + $0x388] sm:$0xf] }
  0x54   :  { %1073 = vmatpush.bf16.msra.mxu2 %v1872_v33  ;;  %1086 = vmatpush.bf16.msra.mxu3 %v2000_v34  ;;  %v2212_v33 = vld [vmem:[#allocation8 + $0xd4] sm:$0xf0]  ;;  %v1892_v20 = vor.u32 %v2272_v13, %v1891_v10  ;;  %v2210_v10 = vld [vmem:[#allocation8 + $0xcc] sm:$0xf] }
  0x55   :  { %v1652_v40 = vor.u32 %v2212_v33, %v1651_v32  ;;  %v2300_v25 = vld [vmem:[#allocation8 + $0x394] sm:$0xf0] }
  0x56   :  { %1048 = vmatpush.bf16.msra.mxu0 %v1600_v35  ;;  %1061 = vmatpush.bf16.msra.mxu1 %v1728_v36  ;;  %v1779_v36 = vld [vmem:[#allocation8 + $0x1c8] sm:$0xf]  ;;  %v2004_v33 = vor.u32 %v2300_v25, %v2003_v24  ;;  %v2260_v49 = vld [vmem:[#allocation8 + $0x254] sm:$0xf0] }
  0x58   :  { %1074 = vmatpush.bf16.msra.mxu2 %v1856_v46  ;;  %1087 = vmatpush.bf16.msra.mxu3 %v1984_v48  ;;  %v1780_v48 = vor.u32 %v2244_v37, %v1779_v36  ;;  %v1859_v36 = vld [vmem:[#allocation8 + $0x268] sm:$0xf]  ;;  %v2264_v37 = vld [vmem:[#allocation8 + $0x274] sm:$0xf0] }
  0x5a   :  { %1049 = vmatpush.bf16.msra.mxu0 %v1584_v41  ;;  %1062 = vmatpush.bf16.msra.mxu1 %v1712_v42  ;;  %v1923_v41 = vld [vmem:[#allocation8 + $0x2e8] sm:$0xf]  ;;  %v2280_v42 = vld [vmem:[#allocation8 + $0x2f4] sm:$0xf0] }
  0x5b   :  { %v1924_v56 = vor.u32 %v2280_v42, %v1923_v41  ;;  %v1571_v42 = vld [vmem:[#allocation8 + $0x28] sm:$0xf] }
  0x5c   :  { %1075 = vmatpush.bf16.msra.mxu2 %v1840_v58  ;;  %1088 = vmatpush.bf16.msra.mxu3 %v1968_v60  ;;  %v2276_v60 = vld [vmem:[#allocation8 + $0x2d4] sm:$0xf0]  ;;  %v1572_v52 = vor.u32 %v2192_v43, %v1571_v42  ;;  %v2202_v42 = vld [vmem:[#allocation8 + $0x8c] sm:$0xf]  ;;  %v1621_v43 = vld [vmem:[#allocation8 + $0x98] sm:$0xf0] }
  0x5e   :  { %1050 = vmatpush.bf16.msra.mxu0 %v1568_v51  ;;  %1063 = vmatpush.bf16.msra.mxu1 %v1696_v54  ;;  %v2208_v51 = vld [vmem:[#allocation8 + $0xb4] sm:$0xf0] }
  0x5f   :  { %v1636_v58 = vor.u32 %v2208_v51, %v1635_v50  ;;  %v1971_v50 = vld [vmem:[#allocation8 + $0x348] sm:$0xf]  ;;  %v2292_v51 = vld [vmem:[#allocation8 + $0x354] sm:$0xf0] }
  0x60   :  { %1076 = vmatpush.bf16.msra.mxu2 %v1824_v5  ;;  %1089 = vmatpush.bf16.msra.mxu3 %v1952_v8  ;;  %v2236_v5 = vld [vmem:[#allocation8 + $0x194] sm:$0xf0]  ;;  %v1908_v8 = vor.u32 %v2276_v60, %v1907_v59  ;;  %v1669_v59 = vld [vmem:[#allocation8 + $0xf8] sm:$0xf0] }
  0x61   :  { %v1748_v12 = vor.u32 %v2236_v5, %v1747_v4  ;;  %v1955_v4 = vld [vmem:[#allocation8 + $0x328] sm:$0xf]  ;;  %v2288_v5 = vld [vmem:[#allocation8 + $0x334] sm:$0xf0] }
  0x62   :  { %1051 = vmatpush.bf16.msra.mxu0 %v1552_v0  ;;  %1064 = vmatpush.bf16.msra.mxu1 %v1680_v2  ;;  %v2035_v0 = vld [vmem:[#allocation8 + $0x3c8] sm:$0xf] }
  0x63   :  { %v1619_v2 = vld [vmem:[#allocation8 + $0x88] sm:$0xf]  ;;  %v2036_v9 = vor.u32 %v2308_v1, %v2035_v0  ;;  %v2246_v0 = vld [vmem:[#allocation8 + $0x1ec] sm:$0xf]  ;;  %v1797_v1 = vld [vmem:[#allocation8 + $0x1f8] sm:$0xf0] }
  0x64   :  { %1077 = vmatpush.bf16.msra.mxu2 %v1808_v11  ;;  %1090 = vmatpush.bf16.msra.mxu3 %v1936_v14  ;;  %v1620_v11 = vor.u32 %v2204_v3, %v1619_v2  ;;  %v2019_v14 = vld [vmem:[#allocation8 + $0x3a8] sm:$0xf]  ;;  %v2256_v3 = vld [vmem:[#allocation8 + $0x234] sm:$0xf0] }
  0x65   :  { %v1827_v2 = vld [vmem:[#allocation8 + $0x228] sm:$0xf] }
  0x66   :  { %v1828_v13 = vor.u32 %v2256_v3, %v1827_v2 }
  0xa2   :  { %v163_v18 = vpop.f32.mrf.mxu0  ;;  %v176_v19 = vpop.f32.mrf.mxu1 }
  0xa3   :  { %v164_v21 = vadd.f32 %v163_v18, %v119_v16  ;;  %v177_v22 = vadd.f32 %v176_v19, %v120_v17  ;;  %v1603_v16 = vld [vmem:[#allocation8 + $0x68] sm:$0xf]  ;;  %v2200_v17 = vld [vmem:[#allocation8 + $0x74] sm:$0xf0] }
  0xa4   :  { %v1731_v18 = vld [vmem:[#allocation8 + $0x168] sm:$0xf]  ;;  %v2232_v19 = vld [vmem:[#allocation8 + $0x174] sm:$0xf0] }
  0xa5   :  { %v206_v26 = vmax.f32 %v164_v21, 0.0  ;;  %v207_v27 = vmax.f32 %v177_v22, 0.0  ;;  %v2020_v21 = vor.u32 %v2304_v15, %v2019_v14  ;;  %v1875_v22 = vld [vmem:[#allocation8 + $0x288] sm:$0xf]  ;;  %v1956_v14 = vor.u32 %v2288_v5, %v1955_v4  ;;  %v1781_v15 = vld [vmem:[#allocation8 + $0x1d8] sm:$0xf0] }
  0xa6   :  { %v1876_v32 = vor.u32 %v2268_v23, %v1875_v22  ;;  %v2310_v22 = vld [vmem:[#allocation8 + $0x3ec] sm:$0xf]  ;;  %v2053_v23 = vld [vmem:[#allocation8 + $0x3f8] sm:$0xf0] }
  0xa7   :  { %v2612_v34 = vpack.c.bf16 %v206_v26, %v206_v26  ;;  %v2614_v35 = vpack.c.bf16 %v207_v27, %v207_v27  ;;  %v1604_v26 = vor.u32 %v2200_v17, %v1603_v16  ;;  %v1732_v27 = vor.u32 %v2232_v19, %v1731_v18  ;;  %v1811_v16 = vld [vmem:[#allocation8 + $0x208] sm:$0xf]  ;;  %v2252_v17 = vld [vmem:[#allocation8 + $0x214] sm:$0xf0]  ;;  %v2194_v4 = vld [vmem:[#allocation8 + $0x4c] sm:$0xf] }
  0xa8   :  { %v1939_v18 = vld [vmem:[#allocation8 + $0x308] sm:$0xf]  ;;  %v2284_v19 = vld [vmem:[#allocation8 + $0x314] sm:$0xf0]  ;;  %v1589_v5 = vld [vmem:[#allocation8 + $0x58] sm:$0xf0] }
  0xa9   :  { %1000 = vmatmul.bf16.vlgmr.msrb.gmra.mxu0 %v2612_v34  ;;  %1013 = vmatmul.bf16.vlgmr.msrb.gmra.mxu1 %v2614_v35 }
  0xaa   :  { %v189_v38 = vpop.f32.mrf.mxu2  ;;  %v202_v39 = vpop.f32.mrf.mxu3  ;;  %1096 = vmatpush.bf16.msrb.mxu0 %v1668_v30  ;;  %1109 = vmatpush.bf16.msrb.mxu1 %v1796_v31  ;;  %v1715_v30 = vld [vmem:[#allocation8 + $0x148] sm:$0xf]  ;;  %v2228_v31 = vld [vmem:[#allocation8 + $0x154] sm:$0xf0] }
  0xab   :  { %v190_v44 = vadd.f32 %v189_v38, %v121_v28  ;;  %v203_v45 = vadd.f32 %v202_v39, %v122_v29  ;;  %v165_v46 = vpop.f32.mrf.mxu0  ;;  %v178_v47 = vpop.f32.mrf.mxu1  ;;  %v1587_v28 = vld [vmem:[#allocation8 + $0x48] sm:$0xf]  ;;  %v2196_v29 = vld [vmem:[#allocation8 + $0x54] sm:$0xf0]  ;;  %v1716_v41 = vor.u32 %v2228_v31, %v1715_v30  ;;  %v2238_v30 = vld [vmem:[#allocation8 + $0x1ac] sm:$0xf] }
  0xac   :  { %v1987_v38 = vld [vmem:[#allocation8 + $0x368] sm:$0xf]  ;;  %v2296_v39 = vld [vmem:[#allocation8 + $0x374] sm:$0xf0]  ;;  %v1860_v46 = vor.u32 %v2264_v37, %v1859_v36  ;;  %v1765_v31 = vld [vmem:[#allocation8 + $0x1b8] sm:$0xf0] }
  0xad   :  { %v208_v54 = vmax.f32 %v190_v44, 0.0  ;;  %v209_v55 = vmax.f32 %v203_v45, 0.0  ;;  %v1699_v44 = vld [vmem:[#allocation8 + $0x128] sm:$0xf]  ;;  %v2224_v45 = vld [vmem:[#allocation8 + $0x134] sm:$0xf0]  ;;  %v1988_v47 = vor.u32 %v2296_v39, %v1987_v38 }
  0xae   :  { %1097 = vmatpush.bf16.msrb.mxu0 %v1652_v40  ;;  %1110 = vmatpush.bf16.msrb.mxu1 %v1780_v48  ;;  %v1588_v40 = vor.u32 %v2196_v29, %v1587_v28  ;;  %v1843_v48 = vld [vmem:[#allocation8 + $0x248] sm:$0xf]  ;;  %v1700_v53 = vor.u32 %v2224_v45, %v1699_v44  ;;  %v1940_v28 = vor.u32 %v2284_v19, %v1939_v18  ;;  %v1637_v29 = vld [vmem:[#allocation8 + $0xb8] sm:$0xf0]  ;;  %v2274_v36 = vld [vmem:[#allocation8 + $0x2cc] sm:$0xf] }
  0xaf   :  { %v2618_v61 = vpack.c.bf16 %v208_v54, %v208_v54  ;;  %v2620_v62 = vpack.c.bf16 %v209_v55, %v209_v55  ;;  %v1555_v54 = vld [vmem:[#allocation8 + $0x8] sm:$0xf]  ;;  %v2188_v55 = vld [vmem:[#allocation8 + $0x14] sm:$0xf0]  ;;  %v1844_v60 = vor.u32 %v2260_v49, %v1843_v48  ;;  %v1909_v37 = vld [vmem:[#allocation8 + $0x2d8] sm:$0xf0] }
  0xb0   :  { %v2306_v38 = vld [vmem:[#allocation8 + $0x3cc] sm:$0xf]  ;;  %v2037_v39 = vld [vmem:[#allocation8 + $0x3d8] sm:$0xf0] }
  0xb1   :  { %1026 = vmatmul.bf16.vlgmr.msrb.gmra.mxu2 %v2618_v61  ;;  %1039 = vmatmul.bf16.vlgmr.msrb.gmra.mxu3 %v2620_v62  ;;  %v2234_v44 = vld [vmem:[#allocation8 + $0x18c] sm:$0xf]  ;;  %v1749_v45 = vld [vmem:[#allocation8 + $0x198] sm:$0xf0] }
  0xb2   :  { %1122 = vmatpush.bf16.msrb.mxu2 %v1924_v56  ;;  %1135 = vmatpush.bf16.msrb.mxu3 %v2052_v57  ;;  %v191_v6 = vpop.f32.mrf.mxu2  ;;  %v204_v7 = vpop.f32.mrf.mxu3  ;;  %v1683_v56 = vld [vmem:[#allocation8 + $0x108] sm:$0xf]  ;;  %v2220_v57 = vld [vmem:[#allocation8 + $0x114] sm:$0xf0]  ;;  %v2270_v48 = vld [vmem:[#allocation8 + $0x2ac] sm:$0xf] }
  0xb3   :  { %1098 = vmatpush.bf16.msrb.mxu0 %v1636_v58  ;;  %1111 = vmatpush.bf16.msrb.mxu1 %v1764_v63  ;;  %v2214_v58 = vld [vmem:[#allocation8 + $0xec] sm:$0xf]  ;;  %v1972_v63 = vor.u32 %v2292_v51, %v1971_v50  ;;  %v1556_v6 = vor.u32 %v2188_v55, %v1555_v54  ;;  %v1684_v7 = vor.u32 %v2220_v57, %v1683_v56  ;;  %v1893_v49 = vld [vmem:[#allocation8 + $0x2b8] sm:$0xf0] }
  0xb4   :  { %v2302_v50 = vld [vmem:[#allocation8 + $0x3ac] sm:$0xf]  ;;  %v2021_v51 = vld [vmem:[#allocation8 + $0x3b8] sm:$0xf0] }
  0xb5   :  { %v2198_v54 = vld [vmem:[#allocation8 + $0x6c] sm:$0xf]  ;;  %v1605_v55 = vld [vmem:[#allocation8 + $0x78] sm:$0xf0] }
  0xb6   :  { %1123 = vmatpush.bf16.msrb.mxu2 %v1908_v8  ;;  %1136 = vmatpush.bf16.msrb.mxu3 %v2036_v9  ;;  %v1672_v8 = vor.u32 %v2214_v58, %v1669_v59  ;;  %v1800_v9 = vor.u32 %v2246_v0, %v1797_v1  ;;  %v2230_v56 = vld [vmem:[#allocation8 + $0x16c] sm:$0xf]  ;;  %v1733_v57 = vld [vmem:[#allocation8 + $0x178] sm:$0xf0]  ;;  %v1896_v58 = vor.u32 %v2270_v48, %v1893_v49  ;;  %v2319_v49 = vld [vmem:[#allocation11 + $0x30] sm:$0xff] }
  0xb7   :  { %1099 = vmatpush.bf16.msrb.mxu0 %v1620_v11  ;;  %1112 = vmatpush.bf16.msrb.mxu1 %v1748_v12  ;;  %v1653_v11 = vld [vmem:[#allocation8 + $0xd8] sm:$0xf0]  ;;  %v2242_v12 = vld [vmem:[#allocation8 + $0x1cc] sm:$0xf]  ;;  %v2024_v59 = vor.u32 %v2302_v50, %v2021_v51  ;;  %v1608_v2 = vor.u32 %v2198_v54, %v1605_v55  ;;  %v1736_v3 = vor.u32 %v2230_v56, %v1733_v57  ;;  %v2315_v56 = vld [vmem:[#allocation11 + $0x10] sm:$0xff] }
  0xb8   :  { %v1656_v24 = vor.u32 %v2210_v10, %v1653_v11  ;;  %v1784_v25 = vor.u32 %v2242_v12, %v1781_v15  ;;  %v2298_v0 = vld [vmem:[#allocation8 + $0x38c] sm:$0xf]  ;;  %v2005_v1 = vld [vmem:[#allocation8 + $0x398] sm:$0xf0]  ;;  %v2327_v57 = vld [vmem:[#allocation11 + $0x70] sm:$0xff] }
  0xb9   :  { %1052 = vmatmul.bf16.vlgmr.msra.gmra.mxu0 %v2612_v34  ;;  %1065 = vmatmul.bf16.vlgmr.msra.gmra.mxu1 %v2614_v35  ;;  %v2262_v10 = vld [vmem:[#allocation8 + $0x26c] sm:$0xf]  ;;  %v1861_v11 = vld [vmem:[#allocation8 + $0x278] sm:$0xf0] }
  0xba   :  { %1124 = vmatpush.bf16.msrb.mxu2 %v1892_v20  ;;  %1137 = vmatpush.bf16.msrb.mxu3 %v2020_v21  ;;  %v2278_v20 = vld [vmem:[#allocation8 + $0x2ec] sm:$0xf]  ;;  %v1925_v21 = vld [vmem:[#allocation8 + $0x2f8] sm:$0xf0] }
  0xbb   :  { %1100 = vmatpush.bf16.msrb.mxu0 %v1604_v26  ;;  %1113 = vmatpush.bf16.msrb.mxu1 %v1732_v27  ;;  %v2206_v26 = vld [vmem:[#allocation8 + $0xac] sm:$0xf]  ;;  %v1812_v27 = vor.u32 %v2252_v17, %v1811_v16  ;;  %v1573_v17 = vld [vmem:[#allocation8 + $0x38] sm:$0xf0] }
  0xbc   :  { %v2294_v12 = vld [vmem:[#allocation8 + $0x36c] sm:$0xf]  ;;  %v1701_v19 = vld [vmem:[#allocation8 + $0x138] sm:$0xf0] }
  0xbd   :  { %v2190_v16 = vld [vmem:[#allocation8 + $0x2c] sm:$0xf]  ;;  %v1941_v48 = vld [vmem:[#allocation8 + $0x318] sm:$0xf0] }
  0xbe   :  { %1125 = vmatpush.bf16.msrb.mxu2 %v1876_v32  ;;  %1138 = vmatpush.bf16.msrb.mxu3 %v2004_v33  ;;  %v1928_v32 = vor.u32 %v2278_v20, %v1925_v21  ;;  %v2056_v33 = vor.u32 %v2310_v22, %v2053_v23  ;;  %v2222_v18 = vld [vmem:[#allocation8 + $0x12c] sm:$0xf]  ;;  %v1864_v20 = vor.u32 %v2262_v10, %v1861_v11  ;;  %v1845_v23 = vld [vmem:[#allocation8 + $0x258] sm:$0xf0] }
  0xbf   :  { %1101 = vmatpush.bf16.msrb.mxu0 %v1588_v40  ;;  %1114 = vmatpush.bf16.msrb.mxu1 %v1716_v41  ;;  %v1640_v40 = vor.u32 %v2206_v26, %v1637_v29  ;;  %v1768_v41 = vor.u32 %v2238_v30, %v1765_v31  ;;  %v2258_v22 = vld [vmem:[#allocation8 + $0x24c] sm:$0xf]  ;;  %v1576_v26 = vor.u32 %v2190_v16, %v1573_v17  ;;  %v1557_v29 = vld [vmem:[#allocation8 + $0x18] sm:$0xf0] }
  0xc0   :  { %v2218_v30 = vld [vmem:[#allocation8 + $0x10c] sm:$0xf]  ;;  %v1685_v31 = vld [vmem:[#allocation8 + $0x118] sm:$0xf0] }
  0xc1   :  { %1078 = vmatmul.bf16.vlgmr.msra.gmra.mxu2 %v2618_v61  ;;  %1091 = vmatmul.bf16.vlgmr.msra.gmra.mxu3 %v2620_v62  ;;  %v2328_v54 = vld [vmem:[#allocation11 + $0x78] sm:$0xff]  ;;  %v2330_v17 = vld [vmem:[#allocation11 + $0x88] sm:$0xff] }
  0xc2   :  { %1126 = vmatpush.bf16.msrb.mxu2 %v1860_v46  ;;  %1139 = vmatpush.bf16.msrb.mxu3 %v1988_v47  ;;  %v1912_v46 = vor.u32 %v2274_v36, %v1909_v37  ;;  %v2040_v47 = vor.u32 %v2306_v38, %v2037_v39  ;;  %v2254_v36 = vld [vmem:[#allocation8 + $0x22c] sm:$0xf]  ;;  %v1829_v37 = vld [vmem:[#allocation8 + $0x238] sm:$0xf0] }
  0xc3   :  { %1102 = vmatpush.bf16.msrb.mxu0 %v1572_v52  ;;  %1115 = vmatpush.bf16.msrb.mxu1 %v1700_v53  ;;  %v1624_v52 = vor.u32 %v2202_v42, %v1621_v43  ;;  %v1752_v53 = vor.u32 %v2234_v44, %v1749_v45  ;;  %v2286_v38 = vld [vmem:[#allocation8 + $0x32c] sm:$0xf]  ;;  %v1957_v39 = vld [vmem:[#allocation8 + $0x338] sm:$0xf0]  ;;  %v1832_v43 = vor.u32 %v2254_v36, %v1829_v37 }
  0xc4   :  { %v2320_v42 = vld [vmem:[#allocation11 + $0x38] sm:$0xff]  ;;  %v1960_v44 = vor.u32 %v2286_v38, %v1957_v39  ;;  %v2250_v45 = vld [vmem:[#allocation8 + $0x20c] sm:$0xf]  ;;  %v2341_v39 = vld [vmem:[#allocation11 + $0xe0] sm:$0xff] }
  0xc5   :  { %v2316_v55 = vld [vmem:[#allocation11 + $0x18] sm:$0xff] }
  0xc6   :  { %1127 = vmatpush.bf16.msrb.mxu2 %v1844_v60  ;;  %1140 = vmatpush.bf16.msrb.mxu3 %v1972_v63  ;;  %v2266_v60 = vld [vmem:[#allocation8 + $0x28c] sm:$0xf]  ;;  %v1877_v63 = vld [vmem:[#allocation8 + $0x298] sm:$0xf0] }
  0xc7   :  { %1103 = vmatpush.bf16.msrb.mxu0 %v1556_v6  ;;  %1116 = vmatpush.bf16.msrb.mxu1 %v1684_v7  ;;  %v2226_v6 = vld [vmem:[#allocation8 + $0x14c] sm:$0xf]  ;;  %v1717_v7 = vld [vmem:[#allocation8 + $0x158] sm:$0xf0] }
  0xc8   :  { %v1720_v15 = vor.u32 %v2226_v6, %v1717_v7  ;;  %v2321_v6 = vld [vmem:[#allocation11 + $0x40] sm:$0xff] }
  0xc9   :  { %v2333_v7 = vld [vmem:[#allocation11 + $0xa0] sm:$0xff] }
  0xca   :  { %1128 = vmatpush.bf16.msrb.mxu2 %v1828_v13  ;;  %1141 = vmatpush.bf16.msrb.mxu3 %v1956_v14  ;;  %v1989_v13 = vld [vmem:[#allocation8 + $0x378] sm:$0xf0]  ;;  %v1592_v14 = vor.u32 %v2194_v4, %v1589_v5 }
  0xcb   :  { %1148 = vmatpush.bf16.msra.mxu0 %v1672_v8  ;;  %1161 = vmatpush.bf16.msra.mxu1 %v1800_v9  ;;  %v1880_v8 = vor.u32 %v2266_v60, %v1877_v63  ;;  %v2008_v9 = vor.u32 %v2298_v0, %v2005_v1  ;;  %v1992_v21 = vor.u32 %v2294_v12, %v1989_v13  ;;  %v2323_v60 = vld [vmem:[#allocation11 + $0x50] sm:$0xff]  ;;  %v2322_v0 = vld [vmem:[#allocation11 + $0x48] sm:$0xff] }
  0xcc   :  { %1104 = vmatmul.bf16.vlgmr.msrb.gmra.mxu0 %v2612_v34  ;;  %1117 = vmatmul.bf16.vlgmr.msrb.gmra.mxu1 %v2614_v35  ;;  %v2335_v63 = vld [vmem:[#allocation11 + $0xb0] sm:$0xff]  ;;  %v2334_v1 = vld [vmem:[#allocation11 + $0xa8] sm:$0xff] }
  0xcd   :  { %v2331_v12 = vld [vmem:[#allocation11 + $0x90] sm:$0xff] }
  0xce   :  { %1129 = vmatpush.bf16.msrb.mxu2 %v1812_v27  ;;  %1142 = vmatpush.bf16.msrb.mxu3 %v1940_v28  ;;  %v1704_v27 = vor.u32 %v2222_v18, %v1701_v19  ;;  %v2186_v28 = vld [vmem:[#allocation8 + $0xc] sm:$0xf] }
  0xcf   :  { %1149 = vmatpush.bf16.msra.mxu0 %v1656_v24  ;;  %1162 = vmatpush.bf16.msra.mxu1 %v1784_v25  ;;  %v2290_v24 = vld [vmem:[#allocation8 + $0x34c] sm:$0xf]  ;;  %v1973_v25 = vld [vmem:[#allocation8 + $0x358] sm:$0xf0] }
  0xd1   :  { %1130 = vmatmul.bf16.vlgmr.msrb.gmra.mxu2 %v2618_v61  ;;  %1143 = vmatmul.bf16.vlgmr.msrb.gmra.mxu3 %v2620_v62 }
  0xd2   :  { %1174 = vmatpush.bf16.msra.mxu2 %v1928_v32  ;;  %1187 = vmatpush.bf16.msra.mxu3 %v2056_v33  ;;  %v1848_v32 = vor.u32 %v2258_v22, %v1845_v23  ;;  %v1976_v33 = vor.u32 %v2290_v24, %v1973_v25  ;;  %v2329_v22 = vld [vmem:[#allocation11 + $0x80] sm:$0xff]  ;;  %v2344_v23 = vld [vmem:[#allocation11 + $0xf8] sm:$0xff] }
  0xd3   :  { %1150 = vmatpush.bf16.msra.mxu0 %v1640_v40  ;;  %1163 = vmatpush.bf16.msra.mxu1 %v1768_v41  ;;  %v1560_v40 = vor.u32 %v2186_v28, %v1557_v29  ;;  %v1688_v41 = vor.u32 %v2218_v30, %v1685_v31  ;;  %v2343_v28 = vld [vmem:[#allocation11 + $0xf0] sm:$0xff]  ;;  %v2342_v30 = vld [vmem:[#allocation11 + $0xe8] sm:$0xff] }
  0xd6   :  { %1175 = vmatpush.bf16.msra.mxu2 %v1912_v46  ;;  %1188 = vmatpush.bf16.msra.mxu3 %v2040_v47  ;;  %v1813_v46 = vld [vmem:[#allocation8 + $0x218] sm:$0xf0]  ;;  %v2282_v47 = vld [vmem:[#allocation8 + $0x30c] sm:$0xf] }
  0xd7   :  { %1151 = vmatpush.bf16.msra.mxu0 %v1624_v52  ;;  %1164 = vmatpush.bf16.msra.mxu1 %v1752_v53  ;;  %v1816_v50 = vor.u32 %v2250_v45, %v1813_v46  ;;  %v1944_v51 = vor.u32 %v2282_v47, %v1941_v48  ;;  %v2318_v52 = vld [vmem:[#allocation11 + $0x28] sm:$0xff]  ;;  %v2317_v53 = vld [vmem:[#allocation11 + $0x20] sm:$0xff] }
  0xda   :  { %1176 = vmatpush.bf16.msra.mxu2 %v1896_v58  ;;  %1189 = vmatpush.bf16.msra.mxu3 %v2024_v59  ;;  %v2313_v58 = vld [vmem:[#allocation11] sm:$0xff] }
  0xdb   :  { %1152 = vmatpush.bf16.msra.mxu0 %v1608_v2  ;;  %1165 = vmatpush.bf16.msra.mxu1 %v1736_v3  ;;  %v2325_v59 = vld [vmem:[#allocation11 + $0x60] sm:$0xff]  ;;  %v2636_v2 = vld [vmem:[#allocation10] sm:$0xf] }
  0xdc   :  { %v344_v5 = vperm.slane %v2636_v2, 0  ;;  %v345_v25 = vperm.slane %v2636_v2, 1  ;;  %v346_v46 = vperm.slane %v2636_v2, 2 }
  0xde   :  { %1177 = vmatpush.bf16.msra.mxu2 %v1880_v8  ;;  %1190 = vmatpush.bf16.msra.mxu3 %v2008_v9  ;;  %v2332_v9 = vld [vmem:[#allocation11 + $0x98] sm:$0xff] }
  0xdf   :  { %1153 = vmatpush.bf16.msra.mxu0 %v1592_v14  ;;  %1166 = vmatpush.bf16.msra.mxu1 %v1720_v15 }
  0xe2   :  { %1178 = vmatpush.bf16.msra.mxu2 %v1864_v20  ;;  %1191 = vmatpush.bf16.msra.mxu3 %v1992_v21 }
  0xe3   :  { %1154 = vmatpush.bf16.msra.mxu0 %v1576_v26  ;;  %1167 = vmatpush.bf16.msra.mxu1 %v1704_v27 }
  0xe6   :  { %1179 = vmatpush.bf16.msra.mxu2 %v1848_v32  ;;  %1192 = vmatpush.bf16.msra.mxu3 %v1976_v33 }
  0xe7   :  { %1155 = vmatpush.bf16.msra.mxu0 %v1560_v40  ;;  %1168 = vmatpush.bf16.msra.mxu1 %v1688_v41 }
  0xea   :  { %1180 = vmatpush.bf16.msra.mxu2 %v1832_v43  ;;  %1193 = vmatpush.bf16.msra.mxu3 %v1960_v44  ;;  %v2340_v43 = vld [vmem:[#allocation11 + $0xd8] sm:$0xff] }
  0xeb   :  { %1468 = vmatpush.bf16.msrb.mxu0 %v2320_v42  ;;  %1169 = vmatmul.bf16.vlgmr.msra.gmra.mxu1 %v2614_v35  ;;  %v2326_v35 = vld [vmem:[#allocation11 + $0x68] sm:$0xff] }
  0xec   :  { %1156 = vmatmul.bf16.vlgmr.msra.gmra.mxu0 %v2612_v34  ;;  %1481 = vmatpush.bf16.msrb.mxu1 %v2328_v54  ;;  %v2314_v34 = vld [vmem:[#allocation11 + $0x8] sm:$0xff] }
  0xee   :  { %1181 = vmatpush.bf16.msra.mxu2 %v1816_v50  ;;  %1194 = vmatpush.bf16.msra.mxu3 %v1944_v51 }
  0xef   :  { %1469 = vmatpush.bf16.msrb.mxu0 %v2319_v49  ;;  %v2339_v49 = vld [vmem:[#allocation11 + $0xd0] sm:$0xff] }
  0xf0   :  { %1482 = vmatpush.bf16.msrb.mxu1 %v2327_v57  ;;  %v2337_v57 = vld [vmem:[#allocation11 + $0xc0] sm:$0xff] }
  0xf1   :  { %1182 = vmatmul.bf16.vlgmr.msra.gmra.mxu2 %v2618_v61  ;;  %1195 = vmatmul.bf16.vlgmr.msra.gmra.mxu3 %v2620_v62  ;;  %v2324_v61 = vld [vmem:[#allocation11 + $0x58] sm:$0xff] }
  0xf2   :  { %v2336_v62 = vld [vmem:[#allocation11 + $0xb8] sm:$0xff]  ;;  %1507 = vmatpush.bf16.msrb.mxu3 %v2344_v23 }
  0xf3   :  { %1470 = vmatpush.bf16.msrb.mxu0 %v2318_v52  ;;  %1494 = vmatpush.bf16.msrb.mxu2 %v2336_v62 }
  0xf4   :  { %1483 = vmatpush.bf16.msrb.mxu1 %v2326_v35 }
  0xf6   :  { %1508 = vmatpush.bf16.msrb.mxu3 %v2343_v28 }
  0xf7   :  { %1471 = vmatpush.bf16.msrb.mxu0 %v2317_v53  ;;  %1495 = vmatpush.bf16.msrb.mxu2 %v2335_v63  ;;  %v2338_v53 = vld [vmem:[#allocation11 + $0xc8] sm:$0xff] }
  0xf8   :  { %1484 = vmatpush.bf16.msrb.mxu1 %v2325_v59 }
  0xfa   :  { %1509 = vmatpush.bf16.msrb.mxu3 %v2342_v30 }
  0xfb   :  { %1472 = vmatpush.bf16.msrb.mxu0 %v2316_v55  ;;  %1496 = vmatpush.bf16.msrb.mxu2 %v2334_v1 }
  0xfc   :  { %1485 = vmatpush.bf16.msrb.mxu1 %v2324_v61 }
  0xfe   :  { %1510 = vmatpush.bf16.msrb.mxu3 %v2341_v39 }
  0xff   :  { %1473 = vmatpush.bf16.msrb.mxu0 %v2315_v56  ;;  %1497 = vmatpush.bf16.msrb.mxu2 %v2333_v7 }
 0x100   :  { %1486 = vmatpush.bf16.msrb.mxu1 %v2323_v60 }
 0x102   :  { %1511 = vmatpush.bf16.msrb.mxu3 %v2340_v43 }
 0x103   :  { %1474 = vmatpush.bf16.msrb.mxu0 %v2314_v34  ;;  %1498 = vmatpush.bf16.msrb.mxu2 %v2332_v9 }
 0x104   :  { %1487 = vmatpush.bf16.msrb.mxu1 %v2322_v0  ;;  %v347_v0 = vperm.slane %v2636_v2, 3  ;;  %v2356_v2 = vld [vmem:[%s2654_s6] ss:$0 sm:$0xff] }
 0x106   :  { %1512 = vmatpush.bf16.msrb.mxu3 %v2339_v49 }
 0x107   :  { %1475 = vmatpush.bf16.msrb.mxu0 %v2313_v58  ;;  %1499 = vmatpush.bf16.msrb.mxu2 %v2331_v12 }
 0x108   :  { %1488 = vmatpush.bf16.msrb.mxu1 %v2321_v6 }
 0x10a   :  { %1513 = vmatpush.bf16.msrb.mxu3 %v2338_v53 }
 0x10b   :  { %1500 = vmatpush.bf16.msrb.mxu2 %v2330_v17 }
 0x10e   :  { %1514 = vmatpush.bf16.msrb.mxu3 %v2337_v57 }
 0x10f   :  { %1501 = vmatpush.bf16.msrb.mxu2 %v2329_v22 }
 0x126   :  { %v1001_v3 = vpop.f32.mrf.mxu0  ;;  %v1014_v4 = vpop.f32.mrf.mxu1 }
 0x127   :  { %v1002_v8 = vadd.f32 %v1001_v3, %v344_v5 }
 0x129   :  { %v1015_v13 = vadd.f32 %v1014_v4, %v1002_v8 }
 0x12e   :  { %v1003_v10 = vpop.f32.mrf.mxu0  ;;  %v1016_v11 = vpop.f32.mrf.mxu1 }
 0x134   :  { %v1027_v14 = vpop.f32.mrf.mxu2  ;;  %v1040_v15 = vpop.f32.mrf.mxu3 }
 0x135   :  { %v1028_v16 = vadd.f32 %v1027_v14, %v1015_v13 }
 0x136   :  { %v1053_v19 = vpop.f32.mrf.mxu0  ;;  %v1066_v20 = vpop.f32.mrf.mxu1 }
 0x137   :  { %v1041_v18 = vadd.f32 %v1040_v15, %v1028_v16  ;;  %v1054_v29 = vadd.f32 %v1053_v19, %v345_v25 }
 0x139   :  { %v1200_v21 = vmax.f32 %v1041_v18, 0.0  ;;  %v1067_v33 = vadd.f32 %v1066_v20, %v1054_v29 }
 0x13b   :  { %v1204_v24 = vpack.c.bf16 %v1200_v21, %v1200_v21 }
 0x13c   :  { %v1029_v26 = vpop.f32.mrf.mxu2  ;;  %v1042_v27 = vpop.f32.mrf.mxu3 }
 0x13d   :  { %1476 = vmatmul.bf16.vlgmr.msrb.gmra.mxu0 %v1204_v24 }
 0x13e   :  { %v1055_v31 = vpop.f32.mrf.mxu0  ;;  %v1068_v32 = vpop.f32.mrf.mxu1 }
 0x144   :  { %v1079_v36 = vpop.f32.mrf.mxu2  ;;  %v1092_v37 = vpop.f32.mrf.mxu3 }
 0x145   :  { %v1080_v38 = vadd.f32 %v1079_v36, %v1067_v33 }
 0x147   :  { %v1093_v40 = vadd.f32 %v1092_v37, %v1080_v38 }
 0x149   :  { %v1105_v41 = vpop.f32.mrf.mxu0  ;;  %v1118_v42 = vpop.f32.mrf.mxu1  ;;  %v1201_v44 = vmax.f32 %v1093_v40, 0.0 }
 0x14a   :  { %v1106_v50 = vadd.f32 %v1105_v41, %v346_v46 }
 0x14b   :  { %v1205_v45 = vpack.c.bf16 %v1201_v44, %v1201_v44 }
 0x14c   :  { %v1081_v47 = vpop.f32.mrf.mxu2  ;;  %v1094_v48 = vpop.f32.mrf.mxu3  ;;  %v1119_v54 = vadd.f32 %v1118_v42, %v1106_v50 }
 0x14d   :  { %1489 = vmatmul.bf16.vlgmr.msrb.gmra.mxu1 %v1205_v45 }
 0x151   :  { %v1107_v51 = vpop.f32.mrf.mxu0  ;;  %v1120_v52 = vpop.f32.mrf.mxu1 }
 0x154   :  { %v1131_v55 = vpop.f32.mrf.mxu2  ;;  %v1144_v56 = vpop.f32.mrf.mxu3 }
 0x155   :  { %v1132_v34 = vadd.f32 %v1131_v55, %v1119_v54 }
 0x157   :  { %v1145_v35 = vadd.f32 %v1144_v56, %v1132_v34 }
 0x159   :  { %v1202_v58 = vmax.f32 %v1145_v35, 0.0 }
 0x15b   :  { %v1206_v59 = vpack.c.bf16 %v1202_v58, %v1202_v58 }
 0x15c   :  { %v1133_v61 = vpop.f32.mrf.mxu2  ;;  %v1146_v62 = vpop.f32.mrf.mxu3 }
 0x15d   :  { %1502 = vmatmul.bf16.vlgmr.msrb.gmra.mxu2 %v1206_v59 }
 0x168   :  { %v1170_v63 = vpop.f32.mrf.mxu1 }
 0x169   :  { %v1157_v60 = vpop.f32.mrf.mxu0 }
 0x16a   :  { %v1158_v1 = vadd.f32 %v1157_v60, %v347_v0 }
 0x16c   :  { %v1171_v5 = vadd.f32 %v1170_v63, %v1158_v1 }
 0x170   :  { %v1172_v4 = vpop.f32.mrf.mxu1 }
 0x171   :  { %v1159_v3 = vpop.f32.mrf.mxu0 }
 0x174   :  { %v1183_v6 = vpop.f32.mrf.mxu2  ;;  %v1196_v7 = vpop.f32.mrf.mxu3 }
 0x175   :  { %v1184_v8 = vadd.f32 %v1183_v6, %v1171_v5 }
 0x177   :  { %v1197_v9 = vadd.f32 %v1196_v7, %v1184_v8 }
 0x179   :  { %v1203_v10 = vmax.f32 %v1197_v9, 0.0 }
 0x17b   :  { %v1207_v11 = vpack.c.bf16 %v1203_v10, %v1203_v10 }
 0x17c   :  { %v1185_v12 = vpop.f32.mrf.mxu2  ;;  %v1198_v13 = vpop.f32.mrf.mxu3 }
 0x17d   :  { %1515 = vmatmul.bf16.vlgmr.msrb.gmra.mxu3 %v1207_v11 }
 0x1ba   :  { %v1477_v14 = vpop.f32.mrf.mxu0 }
 0x1bb   :  { %v1478_v20 = vadd.f32 %v2356_v2, %v1477_v14 }
 0x1c2   :  { %v1479_v15 = vpop.f32.mrf.mxu0 }
 0x1ca   :  { %v1490_v16 = vpop.f32.mrf.mxu1 }
 0x1cb   :  { %v1491_v21 = vadd.f32 %v1490_v16, %v1478_v20 }
 0x1d2   :  { %v1492_v17 = vpop.f32.mrf.mxu1 }
 0x1e0   :  { %v1503_v18 = vpop.f32.mrf.mxu2 }
 0x1e1   :  { %v1504_v22 = vadd.f32 %v1503_v18, %v1491_v21 }
 0x1e8   :  { %v1505_v19 = vpop.f32.mrf.mxu2 }
 0x200   :  { %v1516_v23 = vpop.f32.mrf.mxu3 }
 0x201   :  { %v1517_v24 = vadd.f32 %v1516_v23, %v1504_v22 }
 0x203   :  { %1520 = vst [vmem:[#allocation13] sm:$0xff] %v1517_v24 }
 0x204   :  { %1531 = dma.vmem_to_hbm [thread:$0]  %s1527_s9, 128, %s1529_s12, [#allocation4]  }
 0x208   :  { %v1518_v25 = vpop.f32.mrf.mxu3 }
 0x209   :  { %2533 = dma.done.wait [#allocation4], 128  }
 0x20a   :  { %2534 = vsyncadd [#allocation4], 4294967168 }
 0x20b   :  { %1536 = vsyncpa [#allocation3], 1 }
 0x20c   :  { %1537 = vsyncpa [#allocation6], 1 }
 0x20d   :  { %1538 = vsyncpa [#allocation9], 1 }
 0x20e   :  { %1539 = vsyncpa [#allocation12], 1 }
 0x20f   :  { %1540 = vsyncpa [#allocation4], 1 }

</bundles_post_ra>
